<compile_context>
chip_gen: v5e
topology: v5e:2x2
jax: 0.10.0
libtpu: 0.0.40
codegen_flags: <defaults>
</compile_context>

<pallas_src>
import functools
import math

import jax
import jax.numpy as jnp
from jax.experimental import pallas as pl
from jax.experimental.pallas import tpu as pltpu


def _round_up(x, m):
    return ((x + m - 1) // m) * m


def _cmalmse_kernel(m_ref, p_ref, y_ref, o_ref, *, k, pack, n_valid, needs_mask):
    """One row-tile: partial sum of squared errors -> o_ref (1, 1, 1)."""
    i = pl.program_id(0)
    tm, width = m_ref.shape

    # Stream in native dtype, compute in f32 (cast is free on the VPU).
    m = m_ref[...].astype(jnp.float32)              # (tm, pack*K)
    p = p_ref[...].astype(jnp.float32)              # (tm, pack*K)
    y = y_ref[...].astype(jnp.float32)              # (tm, pack)

    prod = m * p                                    # VPU elementwise
    if pack > 1:
        # Segment-sum over each K-lane group via a block-diagonal ones matmul
        # (keeps lanes dense; MXU is otherwise idle; no relayout needed).
        # Ones matrix generated in-kernel: a few iota/compare ops on ~width/8
        # vregs per step — negligible vs. the multi-MiB tile DMA.
        lane = jax.lax.broadcasted_iota(jnp.int32, (width, pack), 0)
        grp = jax.lax.broadcasted_iota(jnp.int32, (width, pack), 1) * k
        ones = ((lane >= grp) & (lane < grp + k)).astype(jnp.float32)
        pred = jnp.dot(prod, ones, preferred_element_type=jnp.float32)  # (tm, pack)
    else:
        pred = jnp.sum(prod, axis=-1, keepdims=True)                    # (tm, 1)

    diff = pred - y
    sq = diff * diff

    if needs_mask:
        # Only the last grid tile of the cdiv grid over-reads past the end of
        # the arrays; mask it there and keep every other step mask-free.
        last = pl.num_programs(0) - 1

        @pl.when(i == last)
        def _():
            row = jax.lax.broadcasted_iota(jnp.int32, (tm, pack), 0) + i * tm
            # Select AFTER squaring so edge-tile garbage (possibly Inf/NaN)
            # can never propagate into the partial sum.
            o_ref[...] = jnp.sum(jnp.where(row < n_valid, sq, 0.0)).reshape(1, 1, 1)

        @pl.when(i != last)
        def _():
            o_ref[...] = jnp.sum(sq).reshape(1, 1, 1)
    else:
        o_ref[...] = jnp.sum(sq).reshape(1, 1, 1)


def cmalmse(y_pred, y_true):
    """y_pred = (m, b, t, p); returns scalar MSE of sum(m*p, -1) vs y_true."""
    m, b, t, p = y_pred          # b, t unused by the forward pass (PyTorch parity)
    assert m.shape == p.shape
    assert tuple(y_true.shape) == tuple(m.shape[:-1])

    K = m.shape[-1]
    n_rows = math.prod(m.shape[:-1])

    # Zero-copy lane packing: largest `pack` with pack*K <= 128 lanes that
    # divides n_rows exactly, so the reshape below is a free bitcast (no pad,
    # no slice, no extra HBM traffic in any case).
    max_pack = max(1, 128 // K) if K <= 128 else 1
    pack = 1
    for cand in range(min(max_pack, max(n_rows, 1)), 0, -1):
        if n_rows % cand == 0:
            pack = cand
            break
    width = pack * K
    n_packed = n_rows // pack

    m2 = m.reshape(n_packed, width)                 # native dtype, lane-dense
    p2 = p.reshape(n_packed, width)
    y2 = y_true.reshape(n_packed, pack)

    m_isz, p_isz, y_isz = m.dtype.itemsize, p.dtype.itemsize, y_true.dtype.itemsize
    sub_min = max(8, 32 // min(m_isz, p_isz, y_isz))   # sublane tile minimum

    # Generation-aware VMEM budget (v5e/v6e: 128 MiB, v7x: 64 MiB per TC).
    try:
        vmem_cap = int(getattr(pltpu.get_tpu_info(), "vmem_capacity_bytes", 64 << 20))
    except Exception:
        vmem_cap = 64 << 20
    budget = int(vmem_cap * 0.6)      # streaming buffers + f32 working set

    # Per-packed-row VMEM, counted with lane padding (minor dims pad to 128):
    # 2 pipeline buffers per streamed input (m, p, y) + f32 casts / prod
    # temporary + small (tm, pack)->128-lane f32 temporaries (pred/diff/sq/y).
    wpad = _round_up(width, 128)
    gpad = 128
    stream_row = 2 * wpad * (m_isz + p_isz) + 2 * gpad * y_isz
    work_row = 3 * wpad * 4 + 4 * gpad * 4
    per_row = stream_row + work_row

    tm_cap = max(sub_min, (budget // per_row) // sub_min * sub_min)
    # Keep at least two grid steps when the input is big enough: the 1-D grid
    # is "parallel", which is what lets both v7x TensorCores participate.
    half = _round_up((n_packed + 1) // 2, sub_min)
    tm = min(tm_cap, half)
    if tm >= n_packed:
        tm = n_packed                  # single full-extent tile (valid layout)
    grid_n = pl.cdiv(n_packed, tm)
    needs_mask = (n_packed % tm) != 0  # only then does an edge tile read garbage

    tile_bytes = per_row * tm
    vmem_limit = int(min(int(vmem_cap * 0.75),
                         max(32 << 20, tile_bytes + (4 << 20))))

    kernel = functools.partial(_cmalmse_kernel, k=K, pack=pack,
                               n_valid=n_packed, needs_mask=needs_mask)

    partials = pl.pallas_call(
        kernel,
        out_shape=jax.ShapeDtypeStruct((grid_n, 1, 1), jnp.float32),
        grid_spec=pltpu.PrefetchScalarGridSpec(
            num_scalar_prefetch=0,
            grid=(grid_n,),
            in_specs=[
                pl.BlockSpec((tm, width), lambda i: (i, 0)),
                pl.BlockSpec((tm, width), lambda i: (i, 0)),
                pl.BlockSpec((tm, pack), lambda i: (i, 0)),
            ],
            out_specs=pl.BlockSpec((1, 1, 1), lambda i: (i, 0, 0)),
        ),
        compiler_params=pltpu.CompilerParams(
            dimension_semantics=("parallel",),   # per-tile partials: megacore-friendly
            vmem_limit_bytes=vmem_limit,
        ),
    )(m2, p2, y2)

    # Tiny final reduction in the wrapper; divide by the TRUE row count.
    # NOTE: partials accumulate in plain f32; for ~1e8+ rows expect ~1e-5-level
    # relative drift (acceptable for a loss).
    return jnp.sum(partials) / jnp.float32(n_rows)


if __name__ == "__main__":
    key = jax.random.PRNGKey(0)
    k1, k2, k3, k4, k5 = jax.random.split(key, 5)

    B, T, K = 2, 8, 32
    m = jax.random.normal(k1, (B, T, K), dtype=jnp.float32)
    b = jax.random.normal(k2, (B, T, K), dtype=jnp.float32)  # unused by forward
    t = jax.random.normal(k3, (B, T, K), dtype=jnp.float32)  # unused by forward
    p = jax.random.normal(k4, (B, T, K), dtype=jnp.float32)
    y_true = jax.random.normal(k5, (B, T), dtype=jnp.float32)

    loss = cmalmse((m, b, t, p), y_true)
    jax.block_until_ready(loss)
    ref = jnp.mean((jnp.sum(m * p, axis=-1) - y_true) ** 2)
    assert jnp.allclose(loss, ref, rtol=1e-4, atol=1e-4), (loss, ref)

    # n_rows not divisible by 128//K exercises the smaller-pack (width < 128),
    # still zero-copy fallback path.
    B2, T2 = 3, 5
    m_b = jax.random.normal(k1, (B2, T2, K), dtype=jnp.float32)
    p_b = jax.random.normal(k4, (B2, T2, K), dtype=jnp.float32)
    y_b = jax.random.normal(k5, (B2, T2), dtype=jnp.float32)
    loss2 = cmalmse((m_b, m_b, m_b, p_b), y_b)
    jax.block_until_ready(loss2)
    ref2 = jnp.mean((jnp.sum(m_b * p_b, axis=-1) - y_b) ** 2)
    assert jnp.allclose(loss2, ref2, rtol=1e-4, atol=1e-4), (loss2, ref2)

    # Multi-tile case whose last tile is partial: exercises grid_n >= 2 and the
    # edge-tile-only masking path.
    B3, T3 = 4, 37
    m_c = jax.random.normal(k2, (B3, T3, K), dtype=jnp.float32)
    p_c = jax.random.normal(k3, (B3, T3, K), dtype=jnp.float32)
    y_c = jax.random.normal(k4, (B3, T3), dtype=jnp.float32)
    loss3 = cmalmse((m_c, m_c, m_c, p_c), y_c)
    jax.block_until_ready(loss3)
    ref3 = jnp.mean((jnp.sum(m_c * p_c, axis=-1) - y_c) ** 2)
    assert jnp.allclose(loss3, ref3, rtol=1e-4, atol=1e-4), (loss3, ref3)

    print("KERNEL_OK")
</pallas_src>

<mosaic_0001>
module attributes {stable_mosaic.version = 11 : i64} {
  func.func @_cmalmse_kernel(%arg0: i32, %arg1: memref<4x128xf32, #tpu.memory_space<vmem>>, %arg2: memref<4x128xf32, #tpu.memory_space<vmem>>, %arg3: memref<4x4xf32, #tpu.memory_space<vmem>>, %arg4: memref<1x1x1xf32, #tpu.memory_space<vmem>>) attributes {dimension_semantics = [#tpu.dimension_semantics<parallel>], iteration_bounds = array<i64: 1>, scalar_prefetch = 0 : i64, scratch_operands = 0 : i64, tpu.core_type = #tpu.core_type<tc>, window_params = [{transform_indices = @transform_0, window_bounds = array<i64: 4, 128>}, {transform_indices = @transform_1, window_bounds = array<i64: 4, 128>}, {transform_indices = @transform_2, window_bounds = array<i64: 4, 4>}, {transform_indices = @transform_3, window_bounds = array<i64: 1, 1, 1>}]} {
    %c0 = arith.constant 0 : index
    %c0_0 = arith.constant 0 : index
    %0 = vector.load %arg1[%c0, %c0_0] : memref<4x128xf32, #tpu.memory_space<vmem>>, vector<4x128xf32>
    %c0_1 = arith.constant 0 : index
    %c0_2 = arith.constant 0 : index
    %1 = vector.load %arg2[%c0_1, %c0_2] : memref<4x128xf32, #tpu.memory_space<vmem>>, vector<4x128xf32>
    %c0_3 = arith.constant 0 : index
    %c0_4 = arith.constant 0 : index
    %2 = vector.load %arg3[%c0_3, %c0_4] : memref<4x4xf32, #tpu.memory_space<vmem>>, vector<4x4xf32>
    %3 = arith.mulf %0, %1 : vector<4x128xf32>
    %4 = tpu.iota {dimensions = array<i32: 0>} : vector<128x4xi32>
    %5 = tpu.iota {dimensions = array<i32: 1>} : vector<128x4xi32>
    %c32_i32 = arith.constant 32 : i32
    %6 = vector.broadcast %c32_i32 : i32 to vector<128x4xi32>
    %7 = arith.muli %5, %6 : vector<128x4xi32>
    %8 = arith.cmpi sge, %4, %7 : vector<128x4xi32>
    %c32_i32_5 = arith.constant 32 : i32
    %9 = vector.broadcast %c32_i32_5 : i32 to vector<128x4xi32>
    %10 = arith.addi %7, %9 : vector<128x4xi32>
    %11 = arith.cmpi slt, %4, %10 : vector<128x4xi32>
    %12 = arith.andi %8, %11 : vector<128x4xi1>
    %13 = arith.extui %12 : vector<128x4xi1> to vector<128x4xi32>
    %14 = arith.sitofp %13 : vector<128x4xi32> to vector<128x4xf32>
    %cst = arith.constant dense<0.000000e+00> : vector<4x4xf32>
    %15 = tpu.matmul %3, %14, %cst {dimension_numbers = #tpu.dot_dimension_numbers<[1], [0], [0], [1], [0, 0, 1, 1], [], []>} : vector<4x128xf32>, vector<128x4xf32>, vector<4x4xf32> -> vector<4x4xf32>
    %16 = arith.subf %15, %2 : vector<4x4xf32>
    %17 = arith.mulf %16, %16 : vector<4x4xf32>
    %18 = vector.shape_cast %17 : vector<4x4xf32> to vector<1x4x4xf32>
    %cst_6 = arith.constant dense<0.000000e+00> : vector<1xf32>
    %19 = vector.multi_reduction <add>, %18, %cst_6 [1, 2] : vector<1x4x4xf32> to vector<1xf32>
    %20 = vector.shape_cast %19 : vector<1xf32> to vector<1x1x1xf32>
    %21 = vector.extract %20[0, 0, 0] : f32 from vector<1x1x1xf32>
    %22 = vector.broadcast %21 : f32 to vector<1x1x1xf32>
    %c0_7 = arith.constant 0 : index
    %c0_8 = arith.constant 0 : index
    %c0_9 = arith.constant 0 : index
    %23 = vector.load %arg4[%c0_7, %c0_8, %c0_9] : memref<1x1x1xf32, #tpu.memory_space<vmem>>, vector<1x1x1xf32>
    tpu.vector_store %arg4[%c0_7, %c0_8, %c0_9], %22 {strides = array<i32>} : memref<1x1x1xf32, #tpu.memory_space<vmem>>, vector<1x1x1xf32>,
    return
  }
  func.func @transform_0(%arg0: i32) -> (i32, i32) {
    %c0_i32 = arith.constant 0 : i32
    %c0_i32_0 = arith.constant 0 : i32
    return %arg0, %c0_i32 : i32, i32
  }
  func.func @transform_1(%arg0: i32) -> (i32, i32) {
    %c0_i32 = arith.constant 0 : i32
    %c0_i32_0 = arith.constant 0 : i32
    return %arg0, %c0_i32 : i32, i32
  }
  func.func @transform_2(%arg0: i32) -> (i32, i32) {
    %c0_i32 = arith.constant 0 : i32
    %c0_i32_0 = arith.constant 0 : i32
    return %arg0, %c0_i32 : i32, i32
  }
  func.func @transform_3(%arg0: i32) -> (i32, i32, i32) {
    %c0_i32 = arith.constant 0 : i32
    %c0_i32_0 = arith.constant 0 : i32
    %c0_i32_1 = arith.constant 0 : i32
    return %arg0, %c0_i32, %c0_i32_0 : i32, i32, i32
  }
}

</mosaic_0001>

<bundles_post_ra>
// kernel: tpu_custom_call.1
= control target key start
LH: loop header
LB: loop body
LE: loop exit
PB: predicated region body
PF: predicated region fallthrough
CT: control target
= control target key end

     0   :  { %8 = vsyncpa [#allocation3], 0  ;;  %s465_s0 = inlined_call_operand.hbm [shape: f32[4,128], index: 0, kind: input, shape index: {}]   ;;  %s466_s1 = inlined_call_operand.hbm [shape: f32[4,128], index: 1, kind: input, shape index: {}]   ;;  %s467_s2 = inlined_call_operand.hbm [shape: f32[4,4], index: 2, kind: input, shape index: {}]   ;;  %s468_s3 = inlined_call_operand.hbm [shape: f32[1,1,1], index: 3, kind: output, shape index: {}]  }
   0x1   :  { %9 = vsyncpa [#allocation6], 0  ;;  %s27_s14 = sshll.u32 %s466_s1, 4  ;;  %s28_s14 = int_to_ptr.hbm [resolvable:$true] %s27_s14 }
   0x2   :  { %10 = vsyncpa [#allocation4], 0  ;;  %s356_s15 = smov [#allocation5]   ;;  %s16_s19 = sshll.u32 %s465_s0, 4  ;;  %s17_s19 = int_to_ptr.hbm [resolvable:$true] %s16_s19 }
   0x3   :  { %s29_s16 = sshll.u32 %s356_s15, 4  ;;  %s357_s20 = smov [#allocation2]   ;;  %s30_s16 = int_to_ptr.vmem [resolvable:$true] %s29_s16 }
   0x4   :  { %32 = dma.hbm_to_vmem [thread:$0]  %s28_s14, 64, %s30_s16, [#allocation6]  }
   0x5   :  { %s18_s21 = sshll.u32 %s357_s20, 4  ;;  %s38_s24 = sshll.u32 %s467_s2, 4  ;;  %s19_s21 = int_to_ptr.vmem [resolvable:$true] %s18_s21  ;;  %s39_s24 = int_to_ptr.hbm [resolvable:$true] %s38_s24 }
   0x6   :  { %21 = dma.hbm_to_vmem [thread:$0]  %s17_s19, 64, %s19_s21, [#allocation3]  }
   0x7   :  { %s358_s1 = smov [#allocation7]  }
   0x8   :  { %s40_s25 = sshll.u32 %s358_s1, 4  ;;  %s41_s25 = int_to_ptr.vmem [resolvable:$true] %s40_s25 }
   0x9   :  { %43 = dma.hbm_to_vmem [thread:$0]  %s39_s24, 64, %s41_s25, [#allocation6]  }
   0xa   :  { %350 = dma.done.wait [#allocation3], 64  }
   0xb   :  { %351 = vsyncadd [#allocation3], 4294967232  ;;  %v60_v0 = vlaneseq }
   0xc   :  { %352 = dma.done.wait [#allocation6], 128  }
   0xd   :  { %353 = vsyncadd [#allocation6], 4294967168  ;;  %v390_v1 = vshrl.u32 %v60_v0, 7  ;;  %v78_v2 = vand.u32 127, %v60_v0  ;;  %v359_v10 = vmov 1.0   ;;  %s360_s0 = smov [#allocation8]  }
   0xe   :  { %v56_v21 = vld [vmem:[#allocation2] sm:$0xf]  ;;  %v57_v22 = vld [vmem:[#allocation5] sm:$0xf]  ;;  %v58_v24 = vld [vmem:[#allocation7] sm:$0xf] }
   0xf   :  { %v76_v3 = vadd.s32 120, %v390_v1  ;;  %v393_v4 = vmul.u32 32, %v78_v2  ;;  %v75_v5 = vadd.s32 112, %v390_v1  ;;  %v74_v6 = vadd.s32 104, %v390_v1  ;;  %s202_s2 = sshll.u32 %s360_s0, 4  ;;  %s204_s28 = sshll.u32 %s468_s3, 4  ;;  %s203_s2 = int_to_ptr.vmem [resolvable:$true] %s202_s2  ;;  %s205_s28 = int_to_ptr.hbm [resolvable:$true] %s204_s28 }
  0x10   :  { %v73_v8 = vadd.s32 96, %v390_v1  ;;  %v72_v9 = vadd.s32 88, %v390_v1  ;;  %v71_v11 = vadd.s32 80, %v390_v1  ;;  %v70_v12 = vadd.s32 72, %v390_v1 }
  0x11   :  { %vm95_vm0 = vcmp.ge.s32.totalorder %v76_v3, %v393_v4  ;;  %v399_v7 = vadd.s32 32, %v393_v4  ;;  %vm94_vm1 = vcmp.ge.s32.totalorder %v75_v5, %v393_v4  ;;  %vm93_vm4 = vcmp.ge.s32.totalorder %v74_v6, %v393_v4 }
  0x12   :  { %vm92_vm8 = vcmp.ge.s32.totalorder %v73_v8, %v393_v4  ;;  %vm91_vm11 = vcmp.ge.s32.totalorder %v72_v9, %v393_v4  ;;  %vm90_vm14 = vcmp.ge.s32.totalorder %v71_v11, %v393_v4  ;;  %v69_v13 = vadd.s32 64, %v390_v1 }
  0x13   :  { %vm112_vm2 = vcmp.lt.s32.totalorder %v76_v3, %v399_v7  ;;  %vm111_vm3 = vcmp.lt.s32.totalorder %v75_v5, %v399_v7  ;;  %vm110_vm5 = vcmp.lt.s32.totalorder %v74_v6, %v399_v7  ;;  %vm109_vm9 = vcmp.lt.s32.totalorder %v73_v8, %v399_v7 }
  0x14   :  { %vm128_vm6 = vmand %vm95_vm0, %vm112_vm2  ;;  %vm108_vm12 = vcmp.lt.s32.totalorder %v72_v9, %v399_v7  ;;  %vm107_vm15 = vcmp.lt.s32.totalorder %v71_v11, %v399_v7  ;;  %vm106_vm2 = vcmp.lt.s32.totalorder %v70_v12, %v399_v7  ;;  %v68_v14 = vadd.s32 56, %v390_v1 }
  0x15   :  { %231 = vmatpush.msk.msra.mxu0 %vm128_vm6, %v359_v10  ;;  %vm127_vm7 = vmand %vm94_vm1, %vm111_vm3  ;;  %vm89_vm1 = vcmp.ge.s32.totalorder %v70_v12, %v393_v4  ;;  %v67_v15 = vadd.s32 48, %v390_v1  ;;  %v66_v16 = vadd.s32 40, %v390_v1  ;;  %v65_v17 = vadd.s32 32, %v390_v1 }
  0x16   :  { %vm126_vm10 = vmand %vm93_vm4, %vm110_vm5  ;;  %vm88_vm4 = vcmp.ge.s32.totalorder %v69_v13, %v393_v4  ;;  %vm105_vm5 = vcmp.lt.s32.totalorder %v69_v13, %v399_v7  ;;  %v64_v18 = vadd.s32 24, %v390_v1  ;;  %v63_v19 = vadd.s32 16, %v390_v1 }
  0x17   :  { %232 = vmatpush.msk.msra.mxu0 %vm127_vm7, %v359_v10  ;;  %vm125_vm13 = vmand %vm92_vm8, %vm109_vm9  ;;  %vm87_vm7 = vcmp.ge.s32.totalorder %v68_v14, %v393_v4  ;;  %vm104_vm8 = vcmp.lt.s32.totalorder %v68_v14, %v399_v7  ;;  %v62_v20 = vadd.s32 8, %v390_v1  ;;  %v59_v23 = vmul.f32 %v57_v22, %v56_v21 }
  0x18   :  { %vm124_vm0 = vmand %vm91_vm11, %vm108_vm12  ;;  %vm103_vm11 = vcmp.lt.s32.totalorder %v67_v15, %v399_v7 }
  0x19   :  { %233 = vmatpush.msk.msra.mxu0 %vm126_vm10, %v359_v10  ;;  %vm123_vm3 = vmand %vm90_vm14, %vm107_vm15  ;;  %vm86_vm10 = vcmp.ge.s32.totalorder %v67_v15, %v393_v4  ;;  %vm102_vm14 = vcmp.lt.s32.totalorder %v66_v16, %v399_v7 }
  0x1a   :  { %vm122_vm6 = vmand %vm89_vm1, %vm106_vm2  ;;  %vm101_vm1 = vcmp.lt.s32.totalorder %v65_v17, %v399_v7 }
  0x1b   :  { %234 = vmatpush.msk.msra.mxu0 %vm125_vm13, %v359_v10  ;;  %vm121_vm9 = vmand %vm88_vm4, %vm105_vm5  ;;  %vm85_vm13 = vcmp.ge.s32.totalorder %v66_v16, %v393_v4  ;;  %vm100_vm4 = vcmp.lt.s32.totalorder %v64_v18, %v399_v7 }
  0x1c   :  { %vm120_vm12 = vmand %vm87_vm7, %vm104_vm8  ;;  %vm99_vm7 = vcmp.lt.s32.totalorder %v63_v19, %v399_v7 }
  0x1d   :  { %235 = vmatpush.msk.msra.mxu0 %vm124_vm0, %v359_v10  ;;  %vm119_vm15 = vmand %vm86_vm10, %vm103_vm11  ;;  %vm84_vm0 = vcmp.ge.s32.totalorder %v65_v17, %v393_v4  ;;  %vm98_vm10 = vcmp.lt.s32.totalorder %v62_v20, %v399_v7 }
  0x1e   :  { %vm118_vm2 = vmand %vm85_vm13, %vm102_vm14  ;;  %vm97_vm13 = vcmp.lt.s32.totalorder %v390_v1, %v399_v7 }
  0x1f   :  { %236 = vmatpush.msk.msra.mxu0 %vm123_vm3, %v359_v10  ;;  %vm83_vm3 = vcmp.ge.s32.totalorder %v64_v18, %v393_v4  ;;  %vm117_vm5 = vmand %vm84_vm0, %vm101_vm1  ;;  %vm183_vm0 = vcmask 27648   ;;  %vm195_vm1 = vcmask 0  }
  0x20   :  { %vm116_vm8 = vmand %vm83_vm3, %vm100_vm4 }
  0x21   :  { %237 = vmatpush.msk.msra.mxu0 %vm122_vm6, %v359_v10  ;;  %vm82_vm6 = vcmp.ge.s32.totalorder %v63_v19, %v393_v4 }
  0x22   :  { %vm115_vm11 = vmand %vm82_vm6, %vm99_vm7 }
  0x23   :  { %238 = vmatpush.msk.msra.mxu0 %vm121_vm9, %v359_v10  ;;  %vm81_vm9 = vcmp.ge.s32.totalorder %v62_v20, %v393_v4 }
  0x24   :  { %vm114_vm14 = vmand %vm81_vm9, %vm98_vm10 }
  0x25   :  { %239 = vmatpush.msk.msra.mxu0 %vm120_vm12, %v359_v10  ;;  %vm80_vm12 = vcmp.ge.s32.totalorder %v390_v1, %v393_v4 }
  0x27   :  { %240 = vmatpush.msk.msra.mxu0 %vm119_vm15, %v359_v10  ;;  %vm113_vm15 = vmand %vm80_vm12, %vm97_vm13 }
  0x29   :  { %241 = vmatpush.msk.msra.mxu0 %vm118_vm2, %v359_v10 }
  0x2b   :  { %242 = vmatpush.msk.msra.mxu0 %vm117_vm5, %v359_v10 }
  0x2d   :  { %243 = vmatpush.msk.msra.mxu0 %vm116_vm8, %v359_v10 }
  0x2f   :  { %244 = vmatpush.msk.msra.mxu0 %vm115_vm11, %v359_v10 }
  0x31   :  { %245 = vmatpush.msk.msra.mxu0 %vm114_vm14, %v359_v10 }
  0x33   :  { %246 = vmatpush.msk.msra.mxu0 %vm113_vm15, %v359_v10 }
  0x34   :  { %177 = vmatmul.f32.vlgmr.msra.gmra.mxu0 %v59_v23 }
  0xb1   :  { %v178_v25 = vpop.f32.mrf.mxu0 }
  0xb2   :  { %v181_v26 = vsub.f32 %v178_v25, %v58_v24 }
  0xb4   :  { %v182_v27 = vmul.f32 %v181_v26, %v181_v26 }
  0xb6   :  { %v184_v28 = vsel %vm183_vm0, %v182_v27, 0.0 }
  0xb7   :  { %185 = vadd.xlane.f32.xlu0 %v184_v28 }
 0x12a   :  { %v186_v29 = vpop.xlane.xlu0 %185 }
 0x12b   :  { %v187_v30 = vrot.slane %v186_v29, 4 }
 0x12d   :  { %v188_v31 = vadd.f32 %v187_v30, %v186_v29 }
 0x12f   :  { %v189_v32 = vrot.slane %v188_v31, 2 }
 0x131   :  { %v190_v33 = vadd.f32 %v189_v32, %v188_v31 }
 0x133   :  { %v191_v34 = vrot.slane %v190_v33, 1 }
 0x135   :  { %v192_v35 = vadd.f32 %v191_v34, %v190_v33 }
 0x137   :  { %247 = vpush %v192_v35 }
 0x168   :  { %s248_s29 = spop %247 }
 0x169   :  { %v194_v36 = vstv %s248_s29 }
 0x16a   :  { %196 = vst.msk [vmem:[#allocation8] sm:$0x1] %vm195_vm1, %v194_v36 }
 0x16b   :  { %207 = dma.vmem_to_hbm [thread:$0]  %s203_s2, 16, %s205_s28, [#allocation4]  }
 0x16c   :  { %354 = dma.done.wait [#allocation4], 16  }
 0x16d   :  { %355 = vsyncadd [#allocation4], 4294967280 }
 0x16e   :  { %212 = vsyncpa [#allocation3], 1 }
 0x16f   :  { %213 = vsyncpa [#allocation6], 1 }
 0x170   :  { %214 = vsyncpa [#allocation4], 1 }

</bundles_post_ra>
